<compile_context>
chip_gen: v5e
topology: v5e:2x2
jax: 0.10.0
libtpu: 0.0.40
codegen_flags: <defaults>
</compile_context>

<pallas_src>
import jax
import jax.numpy as jnp
import numpy as np
from jax.experimental import pallas as pl
from jax.experimental.pallas import tpu as pltpu

LANES = 128  # TPU lane width


def _swish(z):
    # Swish with a single EUP op per element:
    #   sigmoid(z) = 0.5 * (tanh(0.5 * z) + 1)
    # keeps the divide off the VALU (jax.nn.sigmoid's 1/(1+exp(-z)) can lower to
    # VALU Newton iterations while the EUP slot sits idle).
    half = jnp.asarray(0.5, z.dtype)
    one = jnp.asarray(1.0, z.dtype)
    return z * (half * (jnp.tanh(z * half) + one))


def _make_dae_kernel(compute_dtype):
    def dae_mlp_kernel(x_ref,
                       w0_ref, b0_ref,   # layer 0:          (H, F) bf16, (H, 1) f32
                       wm_ref, bm_ref,   # layers 1-3 stack: (3, H, H) bf16, (3, H, 1) f32
                       w4_ref, b4_ref,   # layer 4:          (F, H) bf16, (F, 1) f32
                       o_ref):
        """One batch tile of DAE_NET.forward.

        Feature-major / batch-on-lane tensors:
          x_ref : (F, tile_b) bf16      o_ref : (F, tile_b) f32
        Matmuls run bf16 x bf16 -> f32 accumulation on the MXU; the Swish
        epilogue runs in `compute_dtype` (bf16 on v6e/v7x, f32 on v5e).
        """
        h = x_ref[...]                                            # (F, tb) bf16

        # Layer 0: Linear + Swish
        z = jnp.dot(w0_ref[...], h, preferred_element_type=jnp.float32) + b0_ref[...]
        h = _swish(z.astype(compute_dtype)).astype(jnp.bfloat16)  # (H, tb)

        # Layers 1..3: Linear + Swish (hidden weights stacked along axis 0)
        for l in range(3):
            z = jnp.dot(wm_ref[l], h, preferred_element_type=jnp.float32) + bm_ref[l]
            h = _swish(z.astype(compute_dtype)).astype(jnp.bfloat16)

        # Layer 4: Linear, no activation -> "decoded" output (kept f32 for accuracy)
        out = jnp.dot(w4_ref[...], h, preferred_element_type=jnp.float32) + b4_ref[...]
        o_ref[...] = out.astype(o_ref.dtype)                      # lane-dense store

    return dae_mlp_kernel


def _default_compute_dtype():
    # bf16 VALU/EUP exist on v6e/v7x; keep the Swish epilogue in f32 on v5e and
    # older generations (no bf16 vector/transcendental path there).
    try:
        kind = jax.devices()[0].device_kind.lower()
    except Exception:
        return jnp.float32
    return jnp.bfloat16 if ("v6" in kind or "v7" in kind) else jnp.float32


def _pick_tile_b(B, tile_b):
    """Round tile_b to the lane width, clamp to the batch, keep grid >= 2 if possible."""
    b128 = pl.cdiv(B, LANES) * LANES               # batch rounded up to lane width
    tb = min(max(tile_b, LANES), b128)
    tb = (tb // LANES) * LANES
    # Keep at least 2 grid steps when the batch allows, so the "parallel" axis can
    # shard across the two TensorCores on v7x (irrelevant on v5e/v6e: 1 TC).
    if pl.cdiv(b128, tb) < 2 and b128 >= 2 * LANES:
        tb = max(LANES, (b128 // (2 * LANES)) * LANES)
    return tb


def dae_forward(x, params, *, tile_b=1024, compute_dtype=None,
                feature_major_out=False):
    """Pallas wrapper for DAE_NET.forward.

    x      : (B, input_size) f32   (batch-major, as in the PyTorch module)
    params : [(w, b)] * 5 with w of shape (out, in) f32 and b of shape (out, 1) f32.

    If feature_major_out=True the (input_size, B) result is returned directly so a
    feature-major consumer can absorb the layout and skip the final transpose.
    """
    B, F = x.shape
    (w0, b0), (w1, b1), (w2, b2), (w3, b3), (w4, b4) = params
    H = w0.shape[0]
    assert w4.shape == (F, H)

    if compute_dtype is None:
        compute_dtype = _default_compute_dtype()

    tb = _pick_tile_b(B, tile_b)
    grid = (pl.cdiv(B, tb),)

    # Fused transpose + bf16 cast (single XLA op); no jnp.pad -- the ragged last
    # block reads undefined lanes and its out-of-bounds output writes are dropped.
    x_t = x.T.astype(jnp.bfloat16)                      # (F, B) bf16, batch on lanes

    # Cast weights to bf16 once; stack the three (H, H) hidden layers.
    w0_b = w0.astype(jnp.bfloat16)
    wm_b = jnp.stack([w1, w2, w3]).astype(jnp.bfloat16)  # (3, H, H)
    w4_b = w4.astype(jnp.bfloat16)
    bm = jnp.stack([b1, b2, b3])                         # (3, H, 1) f32

    def rep_spec(arr):
        nd = arr.ndim
        # Whole (tiny) weight/bias array resident every grid step.
        # NOTE: pipeline_mode=pl.Buffered(1) would also drop the per-step re-copy;
        # left at the default here to keep lowering maximally portable.
        return pl.BlockSpec(arr.shape, lambda i, _nd=nd: (0,) * _nd)

    grid_spec = pl.GridSpec(
        grid=grid,
        in_specs=[
            pl.BlockSpec((F, tb), lambda i: (0, i)),    # x tile (batch on lanes)
            rep_spec(w0_b), rep_spec(b0),
            rep_spec(wm_b), rep_spec(bm),
            rep_spec(w4_b), rep_spec(b4),
        ],
        out_specs=pl.BlockSpec((F, tb), lambda i: (0, i)),
    )

    # Advisory cost estimate so XLA schedules the surrounding transpose/slice ops.
    flops = 2 * B * (F * H + 3 * H * H + H * F)
    transcendentals = 4 * H * B                          # one tanh per Swish element
    param_bytes = sum(int(w.size) * 2 + int(b.size) * 4 for (w, b) in params)
    bytes_accessed = B * F * (2 + 4) + param_bytes       # bf16 in + f32 out + weights

    out_t = pl.pallas_call(
        _make_dae_kernel(compute_dtype),
        out_shape=jax.ShapeDtypeStruct((F, B), x.dtype),
        grid_spec=grid_spec,
        compiler_params=pltpu.CompilerParams(
            # "parallel" lets the batch-tile axis shard across the two TCs on v7x.
            dimension_semantics=("parallel",)),
        cost_estimate=pl.CostEstimate(
            flops=flops,
            transcendentals=transcendentals,
            bytes_accessed=bytes_accessed),
    )(x_t, w0_b, b0, wm_b, bm, w4_b, b4)

    if feature_major_out:
        return out_t                                     # (F, B), no extra HBM pass
    return out_t.T                                       # (B, F), module-compatible


def init_dae_params(key, input_size, hidden_size):
    """Xavier-normal weights in PyTorch layout (out, in), zero biases (out, 1)."""
    dims = [(input_size, hidden_size),
            (hidden_size, hidden_size),
            (hidden_size, hidden_size),
            (hidden_size, hidden_size),
            (hidden_size, input_size)]
    params = []
    keys = jax.random.split(key, len(dims))
    for k, (fan_in, fan_out) in zip(keys, dims):
        std = float(np.sqrt(2.0 / (fan_in + fan_out)))   # xavier_normal_, gain=1
        w = jax.random.normal(k, (fan_out, fan_in), dtype=jnp.float32) * std
        b = jnp.zeros((fan_out, 1), dtype=jnp.float32)
        params.append((w, b))
    return params


def dae_forward_ref(x, params):
    """Pure-JAX f32 reference of DAE_NET.forward for the correctness check."""
    h = x
    for i, (w, b) in enumerate(params):
        h = h @ w.T + b[:, 0]
        if i < len(params) - 1:
            h = h * jax.nn.sigmoid(h)   # Swish
    return h


if __name__ == "__main__":
    key = jax.random.PRNGKey(0)
    k_param, k_x = jax.random.split(key)

    batch = 256          # replay-buffer minibatch: 2 lane-dense tiles of 128 (grid=2)
    input_size = 24      # state_dim + action_dim + state_dim (synthetic)
    hidden_size = 32

    params = init_dae_params(k_param, input_size, hidden_size)
    x = jax.random.normal(k_x, (batch, input_size), dtype=jnp.float32)

    out = dae_forward(x, params)
    out = jax.block_until_ready(out)

    ref = dae_forward_ref(x, params)
    # bf16 input / weights / (on v6e+) activations -> loose tolerance vs f32 reference.
    np.testing.assert_allclose(np.asarray(out), np.asarray(ref), rtol=3e-2, atol=3e-2)

    # TODO(synk): update_parameters (Adam training loop) and penalty() input
    # normalization are host-side training utilities, not part of the forward pass.
    print("KERNEL_OK")
</pallas_src>

<mosaic_0001>
module attributes {stable_mosaic.version = 11 : i64} {
  func.func @dae_mlp_kernel(%arg0: i32, %arg1: memref<24x128xbf16, #tpu.memory_space<vmem>>, %arg2: memref<32x24xbf16, #tpu.memory_space<vmem>>, %arg3: memref<32x1xf32, #tpu.memory_space<vmem>>, %arg4: memref<3x32x32xbf16, #tpu.memory_space<vmem>>, %arg5: memref<3x32x1xf32, #tpu.memory_space<vmem>>, %arg6: memref<24x32xbf16, #tpu.memory_space<vmem>>, %arg7: memref<24x1xf32, #tpu.memory_space<vmem>>, %arg8: memref<24x128xf32, #tpu.memory_space<vmem>>) attributes {dimension_semantics = [#tpu.dimension_semantics<parallel>], iteration_bounds = array<i64: 2>, scalar_prefetch = 0 : i64, scratch_operands = 0 : i64, tpu.core_type = #tpu.core_type<tc>, window_params = [{transform_indices = @transform_0, window_bounds = array<i64: 24, 128>}, {pipeline_mode = #tpu.pipeline_mode<synchronous>, transform_indices = @transform_1, window_bounds = array<i64: 32, 24>}, {pipeline_mode = #tpu.pipeline_mode<synchronous>, transform_indices = @transform_2, window_bounds = array<i64: 32, 1>}, {pipeline_mode = #tpu.pipeline_mode<synchronous>, transform_indices = @transform_3, window_bounds = array<i64: 3, 32, 32>}, {pipeline_mode = #tpu.pipeline_mode<synchronous>, transform_indices = @transform_4, window_bounds = array<i64: 3, 32, 1>}, {pipeline_mode = #tpu.pipeline_mode<synchronous>, transform_indices = @transform_5, window_bounds = array<i64: 24, 32>}, {pipeline_mode = #tpu.pipeline_mode<synchronous>, transform_indices = @transform_6, window_bounds = array<i64: 24, 1>}, {transform_indices = @transform_7, window_bounds = array<i64: 24, 128>}]} {
    %c0 = arith.constant 0 : index
    %c0_0 = arith.constant 0 : index
    %0 = vector.load %arg1[%c0, %c0_0] : memref<24x128xbf16, #tpu.memory_space<vmem>>, vector<24x128xbf16>
    %c0_1 = arith.constant 0 : index
    %c0_2 = arith.constant 0 : index
    %1 = vector.load %arg2[%c0_1, %c0_2] : memref<32x24xbf16, #tpu.memory_space<vmem>>, vector<32x24xbf16>
    %cst = arith.constant dense<0.000000e+00> : vector<32x128xf32>
    %2 = tpu.matmul %1, %0, %cst {dimension_numbers = #tpu.dot_dimension_numbers<[1], [0], [0], [1], [0, 0, 1, 1], [], []>} : vector<32x24xbf16>, vector<24x128xbf16>, vector<32x128xf32> -> vector<32x128xf32>
    %c0_3 = arith.constant 0 : index
    %c0_4 = arith.constant 0 : index
    %3 = vector.load %arg3[%c0_3, %c0_4] : memref<32x1xf32, #tpu.memory_space<vmem>>, vector<32x1xf32>
    %4 = vector.broadcast %3 : vector<32x1xf32> to vector<32x128xf32>
    %5 = arith.addf %2, %4 : vector<32x128xf32>
    %cst_5 = arith.constant 5.000000e-01 : f32
    %6 = vector.broadcast %cst_5 : f32 to vector<32x128xf32>
    %7 = arith.mulf %5, %6 : vector<32x128xf32>
    %8 = math.tanh %7 : vector<32x128xf32>
    %cst_6 = arith.constant 1.000000e+00 : f32
    %9 = vector.broadcast %cst_6 : f32 to vector<32x128xf32>
    %10 = arith.addf %8, %9 : vector<32x128xf32>
    %cst_7 = arith.constant 5.000000e-01 : f32
    %11 = vector.broadcast %cst_7 : f32 to vector<32x128xf32>
    %12 = arith.mulf %11, %10 : vector<32x128xf32>
    %13 = arith.mulf %5, %12 : vector<32x128xf32>
    %14 = arith.truncf %13 : vector<32x128xf32> to vector<32x128xbf16>
    %c0_8 = arith.constant 0 : index
    %c0_9 = arith.constant 0 : index
    %c0_10 = arith.constant 0 : index
    %15 = vector.load %arg4[%c0_8, %c0_9, %c0_10] : memref<3x32x32xbf16, #tpu.memory_space<vmem>>, vector<1x32x32xbf16>
    %16 = vector.shape_cast %15 : vector<1x32x32xbf16> to vector<32x32xbf16>
    %cst_11 = arith.constant dense<0.000000e+00> : vector<32x128xf32>
    %17 = tpu.matmul %16, %14, %cst_11 {dimension_numbers = #tpu.dot_dimension_numbers<[1], [0], [0], [1], [0, 0, 1, 1], [], []>} : vector<32x32xbf16>, vector<32x128xbf16>, vector<32x128xf32> -> vector<32x128xf32>
    %c0_12 = arith.constant 0 : index
    %c0_13 = arith.constant 0 : index
    %c0_14 = arith.constant 0 : index
    %18 = vector.load %arg5[%c0_12, %c0_13, %c0_14] : memref<3x32x1xf32, #tpu.memory_space<vmem>>, vector<1x32x1xf32>
    %19 = vector.shape_cast %18 : vector<1x32x1xf32> to vector<32x1xf32>
    %20 = vector.broadcast %19 : vector<32x1xf32> to vector<32x128xf32>
    %21 = arith.addf %17, %20 : vector<32x128xf32>
    %cst_15 = arith.constant 5.000000e-01 : f32
    %22 = vector.broadcast %cst_15 : f32 to vector<32x128xf32>
    %23 = arith.mulf %21, %22 : vector<32x128xf32>
    %24 = math.tanh %23 : vector<32x128xf32>
    %cst_16 = arith.constant 1.000000e+00 : f32
    %25 = vector.broadcast %cst_16 : f32 to vector<32x128xf32>
    %26 = arith.addf %24, %25 : vector<32x128xf32>
    %cst_17 = arith.constant 5.000000e-01 : f32
    %27 = vector.broadcast %cst_17 : f32 to vector<32x128xf32>
    %28 = arith.mulf %27, %26 : vector<32x128xf32>
    %29 = arith.mulf %21, %28 : vector<32x128xf32>
    %30 = arith.truncf %29 : vector<32x128xf32> to vector<32x128xbf16>
    %c1 = arith.constant 1 : index
    %c0_18 = arith.constant 0 : index
    %c0_19 = arith.constant 0 : index
    %31 = vector.load %arg4[%c1, %c0_18, %c0_19] : memref<3x32x32xbf16, #tpu.memory_space<vmem>>, vector<1x32x32xbf16>
    %32 = vector.shape_cast %31 : vector<1x32x32xbf16> to vector<32x32xbf16>
    %cst_20 = arith.constant dense<0.000000e+00> : vector<32x128xf32>
    %33 = tpu.matmul %32, %30, %cst_20 {dimension_numbers = #tpu.dot_dimension_numbers<[1], [0], [0], [1], [0, 0, 1, 1], [], []>} : vector<32x32xbf16>, vector<32x128xbf16>, vector<32x128xf32> -> vector<32x128xf32>
    %c1_21 = arith.constant 1 : index
    %c0_22 = arith.constant 0 : index
    %c0_23 = arith.constant 0 : index
    %34 = vector.load %arg5[%c1_21, %c0_22, %c0_23] : memref<3x32x1xf32, #tpu.memory_space<vmem>>, vector<1x32x1xf32>
    %35 = vector.shape_cast %34 : vector<1x32x1xf32> to vector<32x1xf32>
    %36 = vector.broadcast %35 : vector<32x1xf32> to vector<32x128xf32>
    %37 = arith.addf %33, %36 : vector<32x128xf32>
    %cst_24 = arith.constant 5.000000e-01 : f32
    %38 = vector.broadcast %cst_24 : f32 to vector<32x128xf32>
    %39 = arith.mulf %37, %38 : vector<32x128xf32>
    %40 = math.tanh %39 : vector<32x128xf32>
    %cst_25 = arith.constant 1.000000e+00 : f32
    %41 = vector.broadcast %cst_25 : f32 to vector<32x128xf32>
    %42 = arith.addf %40, %41 : vector<32x128xf32>
    %cst_26 = arith.constant 5.000000e-01 : f32
    %43 = vector.broadcast %cst_26 : f32 to vector<32x128xf32>
    %44 = arith.mulf %43, %42 : vector<32x128xf32>
    %45 = arith.mulf %37, %44 : vector<32x128xf32>
    %46 = arith.truncf %45 : vector<32x128xf32> to vector<32x128xbf16>
    %c2 = arith.constant 2 : index
    %c0_27 = arith.constant 0 : index
    %c0_28 = arith.constant 0 : index
    %47 = vector.load %arg4[%c2, %c0_27, %c0_28] : memref<3x32x32xbf16, #tpu.memory_space<vmem>>, vector<1x32x32xbf16>
    %48 = vector.shape_cast %47 : vector<1x32x32xbf16> to vector<32x32xbf16>
    %cst_29 = arith.constant dense<0.000000e+00> : vector<32x128xf32>
    %49 = tpu.matmul %48, %46, %cst_29 {dimension_numbers = #tpu.dot_dimension_numbers<[1], [0], [0], [1], [0, 0, 1, 1], [], []>} : vector<32x32xbf16>, vector<32x128xbf16>, vector<32x128xf32> -> vector<32x128xf32>
    %c2_30 = arith.constant 2 : index
    %c0_31 = arith.constant 0 : index
    %c0_32 = arith.constant 0 : index
    %50 = vector.load %arg5[%c2_30, %c0_31, %c0_32] : memref<3x32x1xf32, #tpu.memory_space<vmem>>, vector<1x32x1xf32>
    %51 = vector.shape_cast %50 : vector<1x32x1xf32> to vector<32x1xf32>
    %52 = vector.broadcast %51 : vector<32x1xf32> to vector<32x128xf32>
    %53 = arith.addf %49, %52 : vector<32x128xf32>
    %cst_33 = arith.constant 5.000000e-01 : f32
    %54 = vector.broadcast %cst_33 : f32 to vector<32x128xf32>
    %55 = arith.mulf %53, %54 : vector<32x128xf32>
    %56 = math.tanh %55 : vector<32x128xf32>
    %cst_34 = arith.constant 1.000000e+00 : f32
    %57 = vector.broadcast %cst_34 : f32 to vector<32x128xf32>
    %58 = arith.addf %56, %57 : vector<32x128xf32>
    %cst_35 = arith.constant 5.000000e-01 : f32
    %59 = vector.broadcast %cst_35 : f32 to vector<32x128xf32>
    %60 = arith.mulf %59, %58 : vector<32x128xf32>
    %61 = arith.mulf %53, %60 : vector<32x128xf32>
    %62 = arith.truncf %61 : vector<32x128xf32> to vector<32x128xbf16>
    %c0_36 = arith.constant 0 : index
    %c0_37 = arith.constant 0 : index
    %63 = vector.load %arg6[%c0_36, %c0_37] : memref<24x32xbf16, #tpu.memory_space<vmem>>, vector<24x32xbf16>
    %cst_38 = arith.constant dense<0.000000e+00> : vector<24x128xf32>
    %64 = tpu.matmul %63, %62, %cst_38 {dimension_numbers = #tpu.dot_dimension_numbers<[1], [0], [0], [1], [0, 0, 1, 1], [], []>} : vector<24x32xbf16>, vector<32x128xbf16>, vector<24x128xf32> -> vector<24x128xf32>
    %c0_39 = arith.constant 0 : index
    %c0_40 = arith.constant 0 : index
    %65 = vector.load %arg7[%c0_39, %c0_40] : memref<24x1xf32, #tpu.memory_space<vmem>>, vector<24x1xf32>
    %66 = vector.broadcast %65 : vector<24x1xf32> to vector<24x128xf32>
    %67 = arith.addf %64, %66 : vector<24x128xf32>
    %c0_41 = arith.constant 0 : index
    %c0_42 = arith.constant 0 : index
    %68 = vector.load %arg8[%c0_41, %c0_42] : memref<24x128xf32, #tpu.memory_space<vmem>>, vector<24x128xf32>
    tpu.vector_store %arg8[%c0_41, %c0_42], %67 {strides = array<i32>} : memref<24x128xf32, #tpu.memory_space<vmem>>, vector<24x128xf32>,
    return
  }
  func.func @transform_0(%arg0: i32) -> (i32, i32) {
    %c0_i32 = arith.constant 0 : i32
    %c0_i32_0 = arith.constant 0 : i32
    return %c0_i32, %arg0 : i32, i32
  }
  func.func @transform_1(%arg0: i32) -> (i32, i32) {
    %c0_i32 = arith.constant 0 : i32
    %c0_i32_0 = arith.constant 0 : i32
    %c0_i32_1 = arith.constant 0 : i32
    return %c0_i32, %c0_i32_0 : i32, i32
  }
  func.func @transform_2(%arg0: i32) -> (i32, i32) {
    %c0_i32 = arith.constant 0 : i32
    %c0_i32_0 = arith.constant 0 : i32
    %c0_i32_1 = arith.constant 0 : i32
    return %c0_i32, %c0_i32_0 : i32, i32
  }
  func.func @transform_3(%arg0: i32) -> (i32, i32, i32) {
    %c0_i32 = arith.constant 0 : i32
    %c0_i32_0 = arith.constant 0 : i32
    %c0_i32_1 = arith.constant 0 : i32
    %c0_i32_2 = arith.constant 0 : i32
    return %c0_i32, %c0_i32_0, %c0_i32_1 : i32, i32, i32
  }
  func.func @transform_4(%arg0: i32) -> (i32, i32, i32) {
    %c0_i32 = arith.constant 0 : i32
    %c0_i32_0 = arith.constant 0 : i32
    %c0_i32_1 = arith.constant 0 : i32
    %c0_i32_2 = arith.constant 0 : i32
    return %c0_i32, %c0_i32_0, %c0_i32_1 : i32, i32, i32
  }
  func.func @transform_5(%arg0: i32) -> (i32, i32) {
    %c0_i32 = arith.constant 0 : i32
    %c0_i32_0 = arith.constant 0 : i32
    %c0_i32_1 = arith.constant 0 : i32
    return %c0_i32, %c0_i32_0 : i32, i32
  }
  func.func @transform_6(%arg0: i32) -> (i32, i32) {
    %c0_i32 = arith.constant 0 : i32
    %c0_i32_0 = arith.constant 0 : i32
    %c0_i32_1 = arith.constant 0 : i32
    return %c0_i32, %c0_i32_0 : i32, i32
  }
  func.func @transform_7(%arg0: i32) -> (i32, i32) {
    %c0_i32 = arith.constant 0 : i32
    %c0_i32_0 = arith.constant 0 : i32
    return %c0_i32, %arg0 : i32, i32
  }
}

</mosaic_0001>

<bundles_post_ra>
// kernel: tpu_custom_call.1
= control target key start
LH: loop header
LB: loop body
LE: loop exit
PB: predicated region body
PF: predicated region fallthrough
CT: control target
= control target key end

     0   :  { %12 = vsyncpa [#allocation4], 0  ;;  %s1295_s0 = inlined_call_operand.vmem [shape: bf16[24,256], index: 0, kind: input, shape index: {}]   ;;  %s1296_s1 = inlined_call_operand.vmem [shape: bf16[32,24], index: 1, kind: input, shape index: {}]   ;;  %s1297_s2 = inlined_call_operand.vmem [shape: f32[32,1], index: 2, kind: input, shape index: {}]   ;;  %s1298_s3 = inlined_call_operand.vmem [shape: bf16[3,32,32], index: 3, kind: input, shape index: {}]   ;;  %s1299_s4 = inlined_call_operand.vmem [shape: f32[3,32,1], index: 4, kind: input, shape index: {}]   ;;  %s1300_s5 = inlined_call_operand.vmem [shape: bf16[24,32], index: 5, kind: input, shape index: {}]   ;;  %s1301_s6 = inlined_call_operand.vmem [shape: f32[24,1], index: 6, kind: input, shape index: {}]   ;;  %s1302_s7 = inlined_call_operand.hbm [shape: f32[24,256], index: 7, kind: output, shape index: {}]  }
   0x1   :  { %14 = vsyncpa [#allocation4 + $0x1], 0  ;;  %s1105_s24 = smov 0   ;;  %s1107_s25 = smov 0  }
   0x2   :  { %s1109_s26 = smov 0   ;;  %s1111_s27 = smov 0  }
   0x3 LB: > { %s829_s28 = sadd.s32 4294967295, %s1059_s27   ;;  %s830_s29 = sadd.s32 4294967294, %s1059_s27   ;;  %s1059_s27 = sphi %s1111_s27, %s1308_s27   ;;  %s1055_s26 = sphi %s1109_s26, %s1307_s26   ;;  %s1051_s25 = sphi %s1107_s25, %s1306_s25   ;;  %s1047_s24 = sphi %s1105_s24, %s1305_s24  }
   0x4   : > { %s1128_s30 = sadd.s32 1, %s1059_s27   ;;  %s27_s8 = sadd.s32 1, %s1055_s26 }
   0x5   : > { %s24_s9 = ssub.s32 %s1059_s27, %s1128_s30  ;;  %p34_p0 = scmp.ne.s32.totalorder %s1055_s26, %s1051_s25 }
   0x6   : > { %p25_p1 = scmp.eq.s32.totalorder %s24_s9, 0  ;;  %p35_p2 = scmp.eq.s32.totalorder %s1059_s27, 0 }
   0x7   : > { %p190_p3 = scmp.eq.s32.totalorder %s829_s28, 1  ;;  %p195_p4 = scmp.ne.s32.totalorder %s1051_s25, %s1047_s24 }
   0x8   : > { %s1141_s10 = scalar_select %p25_p1, %s1055_s26, %s27_s8  }
   0x9   : > { %p36_p5 = por %p35_p2, %p34_p0  ;;  %p1143_p6 = por %p190_p3, %p34_p0 }
   0xa   : > { %p196_p7 = scmp.eq.s32.totalorder %s830_s29, 1  ;;  %p832_p9 = scmp.ge.s32.totalorder %s1059_s27, 2 }
   0xc   : > { %p1147_p8 = por %p196_p7, %p195_p4  ;;  %230 = sbr.rel (%p832_p9) target bundleno = 25 (0x19), region = 40 }
  0x11   : > { %233 = sbr.rel (!%p36_p5) target bundleno = 25 (0x19), region = 44  ;;  %s235_s13 = sand.u32 (%p36_p5), 1, %s1055_s26  }
  0x12   : > { %s833_s14 = sshll.u32 (%p36_p5), %s1059_s27, 2  ;;  %s916_s15 = smul.u32 (%p36_p5), 12, %s235_s13 }
  0x13   : > { %s239_s18 = scalar_lea.vmem (%p36_p5), %s1295_s0, %s833_s14 }
  0x14   : > { %v256_v0 = vld [vmem:[%s239_s18] sm:$0xf] (%p36_p5)  ;;  %v258_v1 = vld [vmem:[%s239_s18 + $0x8] sm:$0xf] (%p36_p5)  ;;  %v260_v2 = vld [vmem:[%s239_s18 + $0x10] sm:$0xf] (%p36_p5) }
  0x15   : > { %s237_s19 = scalar_lea.vmem (%p36_p5), [#allocation2], %s916_s15 }
  0x16   : > { %257 = vst [vmem:[%s237_s19] sm:$0xf] %v256_v0 }
  0x17   : > { %259 = vst [vmem:[%s237_s19 + $0x4] sm:$0xf] %v258_v1 }
  0x18   : > { %261 = vst [vmem:[%s237_s19 + $0x8] sm:$0xf] %v260_v2 }
  0x19 PF: > { %p834_p10 = scmp.ge.s32.totalorder %s1059_s27, 1  ;;  %p290_p11 = scmp.lt.s32.totalorder %s1059_s27, 3 }
  0x1b   : > { %p291_p12 = pnand %p834_p10, %p290_p11 }
  0x1c   : > { %s1168_s29 = sand.u32 (!%p291_p12), 1, %s1051_s25   ;;  %s901_s17 = sshll.u32 (!%p291_p12), %s829_s28, 3 }
  0x1d   : > { %294 = sbr.rel (%p291_p12) target bundleno = 899 (0x383), region = 85  ;;  %s758_s20 = scalar_lea.hbm (!%p291_p12), %s1302_s7, %s901_s17 }
  0x1e   : > { %s917_s8 = smul.u32 (!%p291_p12), 12, %s1168_s29  ;;  %s761_s22 = sshll.u32 (!%p291_p12), %s758_s20, 4  ;;  %s762_s22 = int_to_ptr.hbm [resolvable:$true] %s761_s22 }
  0x1f   : > { %s918_s15 = smul.u32 (!%p291_p12), 24, %s1168_s29  ;;  %s748_s23 = scalar_lea.sflag (!%p291_p12), [#allocation4], %s1168_s29 }
  0x20   : > { %s299_s9 = scalar_lea.vmem (!%p291_p12), [#allocation2], %s917_s8  ;;  %s1011_s8 = sshra.s32 (!%p291_p12), %s762_s22, 4  ;;  %s1012_s8 = int_to_ptr.hbm [resolvable:$true] %s1011_s8 }
  0x21   : > { %s327_s16 = scalar_lea.vmem (!%p291_p12), [#allocation3], %s918_s15  ;;  %s1013_s28 = scalar_lea.hbm (!%p291_p12), %s1012_s8, 24 }
  0x22   : > { %v338_v3 = vld [vmem:[%s1297_s2 + $0x10] sm:$0xff]  ;;  %v336_v4 = vld [vmem:[%s1297_s2] sm:$0xff]  ;;  %v1061_v5 = vmov 0   ;;  %vm386_vm0 = vcmask 1043456   ;;  %v339_v8 = vld [vmem:[%s1297_s2 + $0x18] sm:$0xff]  ;;  %vm379_vm1 = vcmask 195584   ;;  %p1014_p13 = scmp.ne.s32.totalorder %s1012_s8, %s1013_s28  ;;  %p1018_p2 = scmp.lt.s32.totalorder %s1012_s8, %s1302_s7 }
  0x23   : > { %963 = vset.pattern.permute.xlu1 %v1061_v5  ;;  %962 = vset.pattern.permute.xlu0 %v1061_v5  ;;  %v331_v6 = vld [vmem:[%s299_s9 + $0x8] sm:$0xf]  ;;  %v904_v12 = vld [vmem:[%s299_s9] sm:$0xff]  ;;  %v866_v17 = vld [vmem:[%s1299_s4 + $0x38] sm:$0xff]  ;;  %vm469_vm2 = vcmask 261120   ;;  %s759_s21 = sshll.u32 %s327_s16, 4  ;;  %s760_s21 = int_to_ptr.vmem [resolvable:$true] %s759_s21 }
  0x24   : > { %352 = vperm.xlu0 %962, %v338_v3   ;;  %342 = vperm.xlu1 %963, %v336_v4   ;;  %v375_v7 = vunpack.c.l.b16 %v331_v6  ;;  %v337_v9 = vld [vmem:[%s1297_s2 + $0x8] sm:$0xff]  ;;  %v905_v13 = vld [vmem:[%s1296_s1] sm:$0xff]  ;;  %v883_v19 = vld [vmem:[%s1299_s4 + $0x50] sm:$0xff]  ;;  %p1015_p0 = pnand %p1014_p13, %p1143_p6  ;;  %s1017_s14 = scalar_lea.hbm %s1302_s7, 48 }
  0x25   : > { %964 = vset.pattern.permute.xlu2 %v1061_v5  ;;  %v906_v14 = vld [vmem:[%s1296_s1 + $0x8] sm:$0xff]  ;;  %v435_v15 = vld [vmem:[%s1299_s4] sm:$0xff]  ;;  %v884_v20 = vld [vmem:[%s1299_s4 + $0x58] sm:$0xff]  ;;  %p1019_p3 = scmp.lt.s32.totalorder %s1017_s14, %s1013_s28 }
  0x26   : > { %v377_v10 = vpack.c.b16 %v375_v7, %v375_v7  ;;  %v436_v16 = vld [vmem:[%s1299_s4 + $0x8] sm:$0xff]  ;;  %v863_v18 = vld [vmem:[%s1299_s4 + $0x20] sm:$0xff]  ;;  %v696_v23 = vld [vmem:[%s1301_s6 + $0x10] sm:$0xff]  ;;  %p1016_p1 = pneg %p1015_p0 }
  0x27   : > { %v882_v21 = vld [vmem:[%s1299_s4 + $0x48] sm:$0xff]  ;;  %v694_v22 = vld [vmem:[%s1301_s6] sm:$0xff]  ;;  %v437_v31 = vld [vmem:[%s1299_s4 + $0x10] sm:$0xff]  ;;  %p1020_p4 = por %p1019_p3, %p1018_p2 }
  0x28   : > { %v388_v11 = vsel %vm386_vm0, %v377_v10, 0  ;;  %451 = vperm.xlu2 %964, %v437_v31   ;;  %v438_v47 = vld [vmem:[%s1299_s4 + $0x18] sm:$0xff]  ;;  %v865_v56 = vld [vmem:[%s1299_s4 + $0x30] sm:$0xff]  ;;  %v907_v61 = vld [vmem:[%s1298_s3] sm:$0xff] }
  0x29   : > { %396 = vmatpush.bf16.msra.mxu0 %v388_v11  ;;  %914 = vmatpush.bf16.msra.mxu1 %v388_v11  ;;  %v864_v62 = vld [vmem:[%s1299_s4 + $0x28] sm:$0xff]  ;;  %v881_v63 = vld [vmem:[%s1299_s4 + $0x40] sm:$0xff]  ;;  %p1021_p5 = pnand %p1020_p4, %p1016_p1 }
  0x2a   : > { %v908_v0 = vld [vmem:[%s1298_s3 + $0x8] sm:$0xff] }
  0x2b   : > { %v695_v1 = vld [vmem:[%s1301_s6 + $0x8] sm:$0xff] }
  0x2c   : > { %357 = vperm.xlu0 %962, %v339_v8   ;;  %347 = vperm.xlu1 %963, %v337_v9  }
  0x2d   : > { %397 = vmatpush.bf16.msra.mxu0 %v904_v12  ;;  %915 = vmatpush.bf16.msra.mxu1 %v904_v12 }
  0x30   : > { %847 = vmatmul.msk.bf16.vlgmr.msra.gmra.mxu0 %vm379_vm1, %v905_v13  ;;  %848 = vmatmul.msk.bf16.vlgmr.msra.gmra.mxu1 %vm379_vm1, %v906_v14 }
  0x31   : > { %456 = vperm.xlu2 %964, %v438_v47  }
  0x34   : > { %441 = vperm.xlu0 %962, %v435_v15   ;;  %446 = vperm.xlu1 %963, %v436_v16  }
  0x39   : > { %539 = vperm.xlu2 %964, %v865_v56  }
  0x3c   : > { %544 = vperm.xlu0 %962, %v866_v17   ;;  %529 = vperm.xlu1 %963, %v863_v18  }
  0x41   : > { %534 = vperm.xlu2 %964, %v864_v62  }
  0x44   : > { %626 = vperm.xlu0 %962, %v883_v19   ;;  %631 = vperm.xlu1 %963, %v884_v20  }
  0x49   : > { %616 = vperm.xlu2 %964, %v881_v63  }
  0x4c   : > { %621 = vperm.xlu0 %962, %v882_v21   ;;  %699 = vperm.xlu1 %963, %v694_v22  }
  0x51   : > { %704 = vperm.xlu2 %964, %v695_v1  }
  0x54   : > { %709 = vperm.xlu0 %962, %v696_v23  }
  0x82   : > { %v452_v4 = vpop.permute.xlu2 %451 }
  0x8b   : > { %v457_v14 = vpop.permute.xlu2 %456 }
  0x96   : > { %v353_v24 = vpop.permute.xlu0 %352  ;;  %v343_v25 = vpop.permute.xlu1 %342 }
  0x9e   : > { %v358_v32 = vpop.permute.xlu0 %357  ;;  %v348_v33 = vpop.permute.xlu1 %347 }
  0xa6   : > { %v447_v5 = vpop.permute.xlu1 %446  ;;  %v442_v9 = vpop.permute.xlu0 %441 }
  0xad   : > { %v399_v26 = vpop.f32.mrf.mxu0  ;;  %v404_v27 = vpop.f32.mrf.mxu1 }
  0xae   : > { %v405_v28 = vadd.f32 %v404_v27, %v353_v24  ;;  %v400_v29 = vadd.f32 %v399_v26, %v343_v25 }
  0xb0   : > { %v411_v30 = vmul.f32 0.5, %v405_v28  ;;  %v409_v34 = vmul.f32 0.5, %v400_v29 }
  0xb2   : > { %965 = vtanh.f32 %v411_v30 }
  0xb3   : > { %967 = vtanh.f32 %v409_v34 }
  0xb5   : > { %v401_v35 = vpop.f32.mrf.mxu0  ;;  %v406_v36 = vpop.f32.mrf.mxu1 }
  0xb6   : > { %v402_v37 = vadd.f32 %v401_v35, %v348_v33  ;;  %v407_v38 = vadd.f32 %v406_v36, %v358_v32  ;;  %v909_v36 = vld [vmem:[%s1298_s3 + $0x10] sm:$0xff] }
  0xb8   : > { %v410_v39 = vmul.f32 0.5, %v402_v37  ;;  %v412_v40 = vmul.f32 0.5, %v407_v38  ;;  %v966_v41 = vpop.eup %965 }
  0xb9   : > { %v419_v42 = vadd.f32 1.0, %v966_v41  ;;  %v968_v43 = vpop.eup %967 }
  0xba   : > { %969 = vtanh.f32 %v410_v39  ;;  %v417_v48 = vadd.f32 1.0, %v968_v43  ;;  %v540_v39 = vpop.permute.xlu2 %539 }
  0xbb   : > { %971 = vtanh.f32 %v412_v40  ;;  %v423_v49 = vmul.f32 0.5, %v419_v42 }
  0xbc   : > { %v421_v53 = vmul.f32 0.5, %v417_v48 }
  0xbd   : > { %v427_v54 = vmul.f32 %v423_v49, %v405_v28 }
  0xbe   : > { %v425_v59 = vmul.f32 %v421_v53, %v400_v29 }
  0xc0   : > { %v970_v44 = vpop.eup %969 }
  0xc1   : > { %v972_v45 = vpop.eup %971  ;;  %v418_v46 = vadd.f32 1.0, %v970_v44 }
  0xc2   : > { %v420_v50 = vadd.f32 1.0, %v972_v45  ;;  %v535_v41 = vpop.permute.xlu2 %534  ;;  %v530_v45 = vpop.permute.xlu1 %529 }
  0xc3   : > { %v422_v51 = vmul.f32 0.5, %v418_v46 }
  0xc4   : > { %v424_v52 = vmul.f32 0.5, %v420_v50  ;;  %v545_v50 = vpop.permute.xlu0 %544 }
  0xc5   : > { %v426_v57 = vmul.f32 %v422_v51, %v402_v37  ;;  %v910_v37 = vld [vmem:[%s1298_s3 + $0x18] sm:$0xff] }
  0xc6   : > { %v428_v55 = vmul.f32 %v424_v52, %v407_v38 }
  0xc7   : > { %v429_v60 = vpack.c.bf16 %v426_v57, %v425_v59 }
  0xc8   : > { %v430_v58 = vpack.c.bf16 %v428_v55, %v427_v54 }
  0xca   : > { %482 = vmatpush.bf16.msrb.mxu1 %v430_v58 }
  0xce   : > { %483 = vmatpush.bf16.msrb.mxu1 %v429_v60 }
  0xd1   : > { %857 = vmatmul.msk.bf16.vlgmr.msrb.gmra.mxu1 %vm469_vm2, %v907_v61 }
  0xe1   : > { %858 = vmatmul.msk.bf16.gmra.mxu1 %vm469_vm2, %v908_v0 }
 0x14e   : > { %v485_v2 = vpop.f32.mrf.mxu1 }
 0x14f   : > { %v486_v10 = vadd.f32 %v485_v2, %v442_v9  ;;  %v912_v9 = vld [vmem:[%s1298_s3 + $0x28] sm:$0xff] }
 0x151   : > { %v495_v13 = vmul.f32 0.5, %v486_v10 }
 0x156   : > { %v487_v3 = vpop.f32.mrf.mxu1 }
 0x157   : > { %v488_v7 = vadd.f32 %v487_v3, %v447_v5 }
 0x159   : > { %v496_v12 = vmul.f32 0.5, %v488_v7 }
 0x15e   : > { %v490_v6 = vpop.f32.mrf.mxu1 }
 0x15f   : > { %v491_v8 = vadd.f32 %v490_v6, %v452_v4 }
 0x161   : > { %v497_v11 = vmul.f32 0.5, %v491_v8 }
 0x163   : > { %973 = vtanh.f32 %v497_v11  ;;  %v627_v11 = vpop.permute.xlu0 %626 }
 0x164   : > { %975 = vtanh.f32 %v496_v12 }
 0x165   : > { %977 = vtanh.f32 %v495_v13 }
 0x166   : > { %v492_v15 = vpop.f32.mrf.mxu1 }
 0x167   : > { %v493_v16 = vadd.f32 %v492_v15, %v457_v14 }
 0x169   : > { %v498_v17 = vmul.f32 0.5, %v493_v16  ;;  %v974_v18 = vpop.eup %973 }
 0x16a   : > { %v976_v19 = vpop.eup %975  ;;  %v505_v20 = vadd.f32 1.0, %v974_v18 }
 0x16b   : > { %979 = vtanh.f32 %v498_v17  ;;  %v978_v21 = vpop.eup %977  ;;  %v504_v22 = vadd.f32 1.0, %v976_v19  ;;  %v622_v13 = vpop.permute.xlu0 %621 }
 0x16c   : > { %v503_v24 = vadd.f32 1.0, %v978_v21  ;;  %v509_v26 = vmul.f32 0.5, %v505_v20  ;;  %v617_v17 = vpop.permute.xlu2 %616 }
 0x16d   : > { %v508_v27 = vmul.f32 0.5, %v504_v22  ;;  %v632_v22 = vpop.permute.xlu1 %631 }
 0x16e   : > { %v507_v29 = vmul.f32 0.5, %v503_v24  ;;  %v513_v30 = vmul.f32 %v509_v26, %v491_v8  ;;  %v911_v8 = vld [vmem:[%s1298_s3 + $0x20] sm:$0xff] }
 0x16f   : > { %v512_v32 = vmul.f32 %v508_v27, %v488_v7 }
 0x170   : > { %v511_v34 = vmul.f32 %v507_v29, %v486_v10 }
 0x171   : > { %v980_v23 = vpop.eup %979 }
 0x172   : > { %v506_v25 = vadd.f32 1.0, %v980_v23  ;;  %v515_v35 = vpack.c.bf16 %v512_v32, %v511_v34 }
 0x174   : > { %v510_v28 = vmul.f32 0.5, %v506_v25 }
 0x176   : > { %v514_v31 = vmul.f32 %v510_v28, %v493_v16 }
 0x178   : > { %v516_v33 = vpack.c.bf16 %v514_v31, %v513_v30 }
 0x17a   : > { %569 = vmatpush.bf16.msra.mxu2 %v516_v33 }
 0x17e   : > { %570 = vmatpush.bf16.msra.mxu2 %v515_v35 }
 0x181   : > { %875 = vmatmul.msk.bf16.vlgmr.msra.gmra.mxu2 %vm469_vm2, %v909_v36 }
 0x191   : > { %876 = vmatmul.msk.bf16.gmra.mxu2 %vm469_vm2, %v910_v37 }
 0x204   : > { %v572_v38 = vpop.f32.mrf.mxu2 }
 0x205   : > { %v573_v46 = vadd.f32 %v572_v38, %v530_v45  ;;  %v693_v45 = vld [vmem:[%s1300_s5 + $0x8] sm:$0xf] }
 0x207   : > { %v582_v49 = vmul.f32 0.5, %v573_v46 }
 0x20c   : > { %v574_v40 = vpop.f32.mrf.mxu2 }
 0x20d   : > { %v575_v43 = vadd.f32 %v574_v40, %v535_v41 }
 0x20f   : > { %v583_v48 = vmul.f32 0.5, %v575_v43 }
 0x214   : > { %v577_v42 = vpop.f32.mrf.mxu2 }
 0x215   : > { %v578_v44 = vadd.f32 %v577_v42, %v540_v39 }
 0x217   : > { %v584_v47 = vmul.f32 0.5, %v578_v44 }
 0x219   : > { %981 = vtanh.f32 %v584_v47 }
 0x21a   : > { %983 = vtanh.f32 %v583_v48  ;;  %v700_v48 = vpop.permute.xlu1 %699 }
 0x21b   : > { %985 = vtanh.f32 %v582_v49 }
 0x21c   : > { %v579_v51 = vpop.f32.mrf.mxu2 }
 0x21d   : > { %v580_v52 = vadd.f32 %v579_v51, %v545_v50  ;;  %v705_v51 = vpop.permute.xlu2 %704 }
 0x21f   : > { %v585_v53 = vmul.f32 0.5, %v580_v52  ;;  %v982_v54 = vpop.eup %981 }
 0x220   : > { %v984_v55 = vpop.eup %983  ;;  %v592_v56 = vadd.f32 1.0, %v982_v54  ;;  %v710_v54 = vpop.permute.xlu0 %709 }
 0x221   : > { %987 = vtanh.f32 %v585_v53  ;;  %v986_v57 = vpop.eup %985  ;;  %v591_v58 = vadd.f32 1.0, %v984_v55 }
 0x222   : > { %v590_v60 = vadd.f32 1.0, %v986_v57  ;;  %v596_v62 = vmul.f32 0.5, %v592_v56 }
 0x223   : > { %v595_v63 = vmul.f32 0.5, %v591_v58 }
 0x224   : > { %v594_v1 = vmul.f32 0.5, %v590_v60  ;;  %v600_v2 = vmul.f32 %v596_v62, %v578_v44  ;;  %v913_v44 = vld [vmem:[%s1300_s5] sm:$0xff] }
 0x225   : > { %v599_v4 = vmul.f32 %v595_v63, %v575_v43 }
 0x226   : > { %v598_v6 = vmul.f32 %v594_v1, %v573_v46  ;;  %v717_v46 = vunpack.c.l.b16 %v693_v45 }
 0x227   : > { %v988_v59 = vpop.eup %987 }
 0x228   : > { %v593_v61 = vadd.f32 1.0, %v988_v59  ;;  %v602_v7 = vpack.c.bf16 %v599_v4, %v598_v6  ;;  %v719_v47 = vpack.c.b16 %v717_v46, %v717_v46 }
 0x22a   : > { %v597_v0 = vmul.f32 0.5, %v593_v61 }
 0x22c   : > { %v601_v3 = vmul.f32 %v597_v0, %v580_v52 }
 0x22e   : > { %v603_v5 = vpack.c.bf16 %v601_v3, %v600_v2 }
 0x230   : > { %656 = vmatpush.bf16.msra.mxu3 %v603_v5 }
 0x234   : > { %657 = vmatpush.bf16.msra.mxu3 %v602_v7 }
 0x237   : > { %893 = vmatmul.msk.bf16.vlgmr.msra.gmra.mxu3 %vm469_vm2, %v911_v8 }
 0x247   : > { %894 = vmatmul.msk.bf16.gmra.mxu3 %vm469_vm2, %v912_v9 }
 0x2ba   : > { %v659_v10 = vpop.f32.mrf.mxu3 }
 0x2bb   : > { %v660_v18 = vadd.f32 %v659_v10, %v617_v17 }
 0x2bd   : > { %v669_v21 = vmul.f32 0.5, %v660_v18 }
 0x2c2   : > { %v661_v12 = vpop.f32.mrf.mxu3 }
 0x2c3   : > { %v662_v15 = vadd.f32 %v661_v12, %v622_v13 }
 0x2c5   : > { %v670_v20 = vmul.f32 0.5, %v662_v15 }
 0x2ca   : > { %v664_v14 = vpop.f32.mrf.mxu3 }
 0x2cb   : > { %v665_v16 = vadd.f32 %v664_v14, %v627_v11 }
 0x2cd   : > { %v671_v19 = vmul.f32 0.5, %v665_v16 }
 0x2cf   : > { %989 = vtanh.f32 %v671_v19 }
 0x2d0   : > { %991 = vtanh.f32 %v670_v20 }
 0x2d1   : > { %993 = vtanh.f32 %v669_v21 }
 0x2d2   : > { %v666_v23 = vpop.f32.mrf.mxu3 }
 0x2d3   : > { %v667_v24 = vadd.f32 %v666_v23, %v632_v22 }
 0x2d5   : > { %v672_v25 = vmul.f32 0.5, %v667_v24  ;;  %v990_v26 = vpop.eup %989 }
 0x2d6   : > { %v992_v27 = vpop.eup %991  ;;  %v679_v28 = vadd.f32 1.0, %v990_v26 }
 0x2d7   : > { %995 = vtanh.f32 %v672_v25  ;;  %v994_v29 = vpop.eup %993  ;;  %v678_v30 = vadd.f32 1.0, %v992_v27 }
 0x2d8   : > { %v677_v32 = vadd.f32 1.0, %v994_v29  ;;  %v683_v33 = vmul.f32 0.5, %v679_v28 }
 0x2d9   : > { %v682_v35 = vmul.f32 0.5, %v678_v30 }
 0x2da   : > { %v681_v37 = vmul.f32 0.5, %v677_v32  ;;  %v687_v38 = vmul.f32 %v683_v33, %v665_v16 }
 0x2db   : > { %v686_v40 = vmul.f32 %v682_v35, %v662_v15 }
 0x2dc   : > { %v685_v42 = vmul.f32 %v681_v37, %v660_v18 }
 0x2dd   : > { %v996_v31 = vpop.eup %995 }
 0x2de   : > { %v680_v34 = vadd.f32 1.0, %v996_v31  ;;  %v689_v43 = vpack.c.bf16 %v686_v40, %v685_v42 }
 0x2e0   : > { %v684_v36 = vmul.f32 0.5, %v680_v34 }
 0x2e2   : > { %v688_v39 = vmul.f32 %v684_v36, %v667_v24 }
 0x2e4   : > { %v690_v41 = vpack.c.bf16 %v688_v39, %v687_v38 }
 0x2e6   : > { %732 = vmatpush.bf16.msrb.mxu0 %v690_v41 }
 0x2ea   : > { %733 = vmatpush.bf16.msrb.mxu0 %v689_v43 }
 0x2ed   : > { %899 = vmatmul.msk.bf16.vlgmr.msrb.gmra.mxu0 %vm469_vm2, %v913_v44 }
 0x2fd   : > { %900 = vmatmul.msk.bf16.gmra.mxu0 %vm469_vm2, %v719_v47 }
 0x36a   : > { %v735_v49 = vpop.f32.mrf.mxu0 }
 0x36b   : > { %v736_v50 = vadd.f32 %v735_v49, %v700_v48 }
 0x36d   : > { %744 = vst [vmem:[%s327_s16] sm:$0xff] %v736_v50 }
 0x372   : > { %v737_v52 = vpop.f32.mrf.mxu0 }
 0x373   : > { %v738_v53 = vadd.f32 %v737_v52, %v705_v51 }
 0x375   : > { %745 = vst [vmem:[%s327_s16 + $0x8] sm:$0xff] %v738_v53 }
 0x37a   : > { %v740_v55 = vpop.f32.mrf.mxu0 }
 0x37b   : > { %v741_v56 = vadd.f32 %v740_v55, %v710_v54 }
 0x37d   : > { %746 = vst [vmem:[%s327_s16 + $0x10] sm:$0xff] %v741_v56 }
 0x37e   : > { %1024 = shalt.err (!%p1021_p5)
}
 0x37f   : > { %s1062_s29 = smov 128   ;;  %s1063_s16 = smov 256  }
 0x380   : > { %s1064_s18 = smov 8  }
 0x381   : > { %919 = dma.vmem_to_hbm [thread:$0]  (%p1143_p6), %s760_s21, 384, %s762_s22, %s748_s23, %s1062_s29, %s1063_s16, %s1064_s18  }
 0x382   : > { %v742_v57 = vpop.f32.mrf.mxu0 }
 0x383 PF: > { %s776_s19 = sand.u32 1, %s1047_s24   ;;  %p922_p7 = pnand %p832_p9, %p1147_p8 }
 0x384   : > { %s777_s20 = scalar_lea.sflag [#allocation4], %s776_s19 }
 0x385   : > { %p923_p10 = pneg %p922_p7 }
 0x387   : > { %1042 = dma.done.wait (%p923_p10), %s777_s20, 384  }
 0x388   : > { %1044 = vsyncadd (%p923_p10), %s777_s20, 4294966912  ;;  %p17_p11 = scmp.ge.s32.totalorder %s1128_s30, 4   ;;  %s1305_s24 = smov %s1051_s25 }
 0x389   : > { %s1306_s25 = smov %s1055_s26  ;;  %s1307_s26 = smov %s1141_s10 }
 0x38a   : > { %s1308_s27 = smov %s1128_s30  ;;  %19 = sbr.rel (!%p17_p11) target bundleno = 3 (0x3), region = 133 }
 0x38f   :  { %783 = vsyncpa [#allocation4], 1 }
 0x390   :  { %785 = vsyncpa [#allocation4 + $0x1], 1 }

</bundles_post_ra>
